<compile_context>
chip_gen: v5e
topology: v5e:2x2
jax: 0.10.0
libtpu: 0.0.40
codegen_flags: <defaults>
</compile_context>

<pallas_src>
import math
import functools

import jax
import jax.numpy as jnp
from jax import lax
from jax.experimental import pallas as pl
from jax.experimental.pallas import tpu as pltpu


def _cosnorm_kernel(x_ref, w_ref, o_ref, ew_ref, *, scale):
    # grid = (C_tiles, B_tiles); B is the inner ("arbitrary") axis, so the
    # normalized-weight scratch written at b == 0 persists for all batch tiles
    # of the current class tile.
    b = pl.program_id(1)

    @pl.when(b == 0)
    def _():
        w = w_ref[...].astype(jnp.float32)                           # (TC, D)
        rnorm_w = lax.rsqrt(jnp.sum(w * w, axis=1, keepdims=True))   # (TC, 1)
        ew_ref[...] = w * rnorm_w                                    # one bcast mul

    x = x_ref[...].astype(jnp.float32)                               # (TB, D)
    ssq = jnp.sum(x * x, axis=1, keepdims=True)                      # (TB, 1)
    rnorm = lax.rsqrt(ssq)                                           # (TB, 1), EUP
    norm_x = ssq * rnorm                                             # = ||x|| (0 -> NaN, torch parity)
    # Single per-row factor: scale * ||x|| / ((1 + ||x||) * ||x||).  All (TB,1)-sized.
    f = (scale * norm_x * rnorm) / (1.0 + norm_x)
    ex_scaled = x * f                                                # ONE (TB,D) pass

    # (TB, D) x (TC, D) contracting dim 1 of both -> (TB, TC); no transpose.
    out = lax.dot_general(
        ex_scaled, ew_ref[...],
        dimension_numbers=(((1,), (1,)), ((), ())),
        preferred_element_type=jnp.float32)
    o_ref[...] = out.astype(o_ref.dtype)


def _round_up(v, m):
    return ((v + m - 1) // m) * m


def cosnorm_classifier(x, weight, scale=16.0, tb=None, tc=None):
    """x: (B, in_dims), weight: (out_dims, in_dims) -> (B, out_dims) f32."""
    B, D = x.shape
    C, D2 = weight.shape
    assert D == D2

    # Tile sizes: TB multiple of 8 (sublane), TC multiple of 128 (lane-dense output).
    TB = tb if tb is not None else min(_round_up(B, 8), 256)
    TC = tc if tc is not None else min(_round_up(C, 128), 512)
    Bp = _round_up(B, TB)
    Cp = _round_up(C, TC)

    xp = x if Bp == B else jnp.pad(x, ((0, Bp - B), (0, 0)))
    wp = weight if Cp == C else jnp.pad(weight, ((0, Cp - C), (0, 0)))

    kernel = functools.partial(_cosnorm_kernel, scale=float(scale))
    out = pl.pallas_call(
        kernel,
        out_shape=jax.ShapeDtypeStruct((Bp, Cp), jnp.float32),
        grid_spec=pltpu.PrefetchScalarGridSpec(
            num_scalar_prefetch=0,
            grid=(Cp // TC, Bp // TB),          # (class tiles, batch tiles); B innermost
            in_specs=[
                pl.BlockSpec((TB, D), lambda j, i: (i, 0)),   # x tile: depends on batch index
                pl.BlockSpec((TC, D), lambda j, i: (j, 0)),   # w tile: depends on class index
            ],
            out_specs=pl.BlockSpec((TB, TC), lambda j, i: (i, j)),
            scratch_shapes=[pltpu.VMEM((TC, D), jnp.float32)],  # normalized weight tile
        ),
        compiler_params=pltpu.CompilerParams(
            dimension_semantics=("parallel", "arbitrary")),
    )(xp, wp)

    if Bp != B or Cp != C:
        out = out[:B, :C]
    return out


def cosnorm_reference(x, weight, scale=16.0):
    norm_x = jnp.linalg.norm(x, ord=2, axis=1, keepdims=True)
    ex = norm_x / (1.0 + norm_x) * (x / norm_x)
    ew = weight / jnp.linalg.norm(weight, ord=2, axis=1, keepdims=True)
    return (scale * ex) @ ew.T


if __name__ == "__main__":
    # Small deterministic setup consistent with the module's __init__:
    #   weight shape (out_dims, in_dims), uniform(-stdv, stdv), stdv = 1/sqrt(in_dims)
    # NOTE: at these toy shapes launch overhead dominates; the tiling above is
    # sized for realistic classifier shapes (large B / C / D).
    B, in_dims, out_dims = 8, 32, 16
    scale = 16.0

    key = jax.random.PRNGKey(0)
    kx, kw = jax.random.split(key)
    x = jax.random.normal(kx, (B, in_dims), dtype=jnp.float32)
    stdv = 1.0 / math.sqrt(in_dims)
    weight = jax.random.uniform(
        kw, (out_dims, in_dims), dtype=jnp.float32, minval=-stdv, maxval=stdv)

    out = cosnorm_classifier(x, weight, scale=scale)
    out = jax.block_until_ready(out)

    ref = cosnorm_reference(x, weight, scale=scale)
    assert out.shape == (B, out_dims)
    assert jnp.allclose(out, ref, atol=1e-4, rtol=1e-5), "mismatch vs reference"

    print("KERNEL_OK")
</pallas_src>

<mosaic_0001>
module attributes {stable_mosaic.version = 11 : i64} {
  func.func @_cosnorm_kernel(%arg0: i32, %arg1: i32, %arg2: memref<8x32xf32, #tpu.memory_space<vmem>>, %arg3: memref<128x32xf32, #tpu.memory_space<vmem>>, %arg4: memref<8x128xf32, #tpu.memory_space<vmem>>, %arg5: memref<128x32xf32, #tpu.memory_space<vmem>>) attributes {dimension_semantics = [#tpu.dimension_semantics<parallel>, #tpu.dimension_semantics<arbitrary>], iteration_bounds = array<i64: 1, 1>, scalar_prefetch = 0 : i64, scratch_operands = 1 : i64, tpu.core_type = #tpu.core_type<tc>, window_params = [{transform_indices = @transform_0, window_bounds = array<i64: 8, 32>}, {transform_indices = @transform_1, window_bounds = array<i64: 128, 32>}, {transform_indices = @transform_2, window_bounds = array<i64: 8, 128>}]} {
    %c0_i32 = arith.constant 0 : i32
    %0 = arith.cmpi eq, %arg1, %c0_i32 : i32
    %1 = arith.extui %0 : i1 to i32
    %c0_i32_0 = arith.constant 0 : i32
    %2 = arith.cmpi ne, %1, %c0_i32_0 : i32
    scf.if %2 {
      %c0_9 = arith.constant 0 : index
      %c0_10 = arith.constant 0 : index
      %20 = vector.load %arg3[%c0_9, %c0_10] : memref<128x32xf32, #tpu.memory_space<vmem>>, vector<128x32xf32>
      %21 = arith.mulf %20, %20 : vector<128x32xf32>
      %cst_11 = arith.constant dense<0.000000e+00> : vector<128xf32>
      %22 = vector.multi_reduction <add>, %21, %cst_11 [1] : vector<128x32xf32> to vector<128xf32>
      %23 = vector.shape_cast %22 : vector<128xf32> to vector<128x1xf32>
      %24 = math.rsqrt %23 : vector<128x1xf32>
      %25 = vector.broadcast %24 : vector<128x1xf32> to vector<128x32xf32>
      %26 = arith.mulf %20, %25 : vector<128x32xf32>
      %c0_12 = arith.constant 0 : index
      %c0_13 = arith.constant 0 : index
      %27 = vector.load %arg5[%c0_12, %c0_13] : memref<128x32xf32, #tpu.memory_space<vmem>>, vector<128x32xf32>
      tpu.vector_store %arg5[%c0_12, %c0_13], %26 {strides = array<i32>} : memref<128x32xf32, #tpu.memory_space<vmem>>, vector<128x32xf32>,
    } else {
    }
    %c0 = arith.constant 0 : index
    %c0_1 = arith.constant 0 : index
    %3 = vector.load %arg2[%c0, %c0_1] : memref<8x32xf32, #tpu.memory_space<vmem>>, vector<8x32xf32>
    %4 = arith.mulf %3, %3 : vector<8x32xf32>
    %cst = arith.constant dense<0.000000e+00> : vector<8xf32>
    %5 = vector.multi_reduction <add>, %4, %cst [1] : vector<8x32xf32> to vector<8xf32>
    %6 = vector.shape_cast %5 : vector<8xf32> to vector<8x1xf32>
    %7 = math.rsqrt %6 : vector<8x1xf32>
    %8 = arith.mulf %6, %7 : vector<8x1xf32>
    %cst_2 = arith.constant 1.600000e+01 : f32
    %9 = vector.broadcast %cst_2 : f32 to vector<8x1xf32>
    %10 = arith.mulf %9, %8 : vector<8x1xf32>
    %11 = arith.mulf %10, %7 : vector<8x1xf32>
    %cst_3 = arith.constant 1.000000e+00 : f32
    %12 = vector.broadcast %cst_3 : f32 to vector<8x1xf32>
    %13 = arith.addf %12, %8 : vector<8x1xf32>
    %14 = arith.divf %11, %13 : vector<8x1xf32>
    %15 = vector.broadcast %14 : vector<8x1xf32> to vector<8x32xf32>
    %16 = arith.mulf %3, %15 : vector<8x32xf32>
    %c0_4 = arith.constant 0 : index
    %c0_5 = arith.constant 0 : index
    %17 = vector.load %arg5[%c0_4, %c0_5] : memref<128x32xf32, #tpu.memory_space<vmem>>, vector<128x32xf32>
    %cst_6 = arith.constant dense<0.000000e+00> : vector<8x128xf32>
    %18 = tpu.matmul %16, %17, %cst_6 {dimension_numbers = #tpu.dot_dimension_numbers<[1], [1], [0], [0], [0, 0, 1, 0], [], []>} : vector<8x32xf32>, vector<128x32xf32>, vector<8x128xf32> -> vector<8x128xf32>
    %c0_7 = arith.constant 0 : index
    %c0_8 = arith.constant 0 : index
    %19 = vector.load %arg4[%c0_7, %c0_8] : memref<8x128xf32, #tpu.memory_space<vmem>>, vector<8x128xf32>
    tpu.vector_store %arg4[%c0_7, %c0_8], %18 {strides = array<i32>} : memref<8x128xf32, #tpu.memory_space<vmem>>, vector<8x128xf32>,
    return
  }
  func.func @transform_0(%arg0: i32, %arg1: i32) -> (i32, i32) {
    %c0_i32 = arith.constant 0 : i32
    %c0_i32_0 = arith.constant 0 : i32
    return %arg1, %c0_i32 : i32, i32
  }
  func.func @transform_1(%arg0: i32, %arg1: i32) -> (i32, i32) {
    %c0_i32 = arith.constant 0 : i32
    %c0_i32_0 = arith.constant 0 : i32
    return %arg0, %c0_i32 : i32, i32
  }
  func.func @transform_2(%arg0: i32, %arg1: i32) -> (i32, i32) {
    %c0_i32 = arith.constant 0 : i32
    return %arg1, %arg0 : i32, i32
  }
}

</mosaic_0001>

<bundles_post_ra>
// kernel: tpu_custom_call.1
= control target key start
LH: loop header
LB: loop body
LE: loop exit
PB: predicated region body
PF: predicated region fallthrough
CT: control target
= control target key end

     0   :  { %vm48_vm0 = vcmask 261120   ;;  %s940_s0 = inlined_call_operand.vmem [shape: f32[8,32], index: 0, kind: input, shape index: {}]   ;;  %s941_s1 = inlined_call_operand.vmem [shape: f32[128,32], index: 1, kind: input, shape index: {}]   ;;  %s942_s2 = inlined_call_operand.hbm [shape: f32[8,128], index: 2, kind: output, shape index: {}]  }
   0x1   :  { %v528_v0 = vld [vmem:[%s941_s1 + $0x78] sm:$0xff]  ;;  %v533_v1 = vld [vmem:[%s941_s1 + $0x68] sm:$0xff]  ;;  %v549_v6 = vld [vmem:[%s941_s1 + $0x70] sm:$0xff] }
   0x2   :  { %v538_v2 = vld [vmem:[%s941_s1 + $0x58] sm:$0xff]  ;;  %v47_v3 = vmul.f32 %v528_v0, %v528_v0  ;;  %v45_v4 = vmul.f32 %v533_v1, %v533_v1  ;;  %v554_v7 = vld [vmem:[%s941_s1 + $0x60] sm:$0xff]  ;;  %v562_v11 = vld [vmem:[%s941_s1 + $0x50] sm:$0xff]  ;;  %v46_v12 = vmul.f32 %v549_v6, %v549_v6 }
   0x3   :  { %v43_v5 = vmul.f32 %v538_v2, %v538_v2  ;;  %v44_v13 = vmul.f32 %v554_v7, %v554_v7 }
   0x4   :  { %v94_v8 = vsel %vm48_vm0, %v47_v3, 0.0  ;;  %v88_v9 = vsel %vm48_vm0, %v45_v4, 0.0 }
   0x5   :  { %v82_v10 = vsel %vm48_vm0, %v43_v5, 0.0  ;;  %95 = vadd.xlane.f32.xlu0 %v94_v8  ;;  %89 = vadd.xlane.f32.xlu1 %v88_v9 }
   0x6   :  { %83 = vadd.xlane.f32.xlu2 %v82_v10 }
   0x7   :  { %7 = vsyncpa [#allocation4], 0  ;;  %v42_v14 = vmul.f32 %v562_v11, %v562_v11  ;;  %v91_v15 = vsel %vm48_vm0, %v46_v12, 0.0  ;;  %v85_v16 = vsel %vm48_vm0, %v44_v13, 0.0  ;;  %v576_v18 = vld [vmem:[%s941_s1 + $0x48] sm:$0xff]  ;;  %v581_v19 = vld [vmem:[%s941_s1 + $0x40] sm:$0xff] }
   0x8   :  { %v586_v20 = vld [vmem:[%s941_s1 + $0x38] sm:$0xff]  ;;  %v41_v21 = vmul.f32 %v576_v18, %v576_v18  ;;  %v40_v22 = vmul.f32 %v581_v19, %v581_v19  ;;  %v600_v27 = vld [vmem:[%s941_s1 + $0x28] sm:$0xff]  ;;  %v605_v28 = vld [vmem:[%s941_s1 + $0x30] sm:$0xff]  ;;  %s420_s17 = sshll.u32 %s942_s2, 4  ;;  %s421_s17 = int_to_ptr.hbm [resolvable:$true] %s420_s17 }
   0x9   :  { %v79_v17 = vsel %vm48_vm0, %v42_v14, 0.0  ;;  %v39_v23 = vmul.f32 %v586_v20, %v586_v20  ;;  %v610_v29 = vld [vmem:[%s941_s1 + $0x20] sm:$0xff]  ;;  %v37_v30 = vmul.f32 %v600_v27, %v600_v27  ;;  %v38_v31 = vmul.f32 %v605_v28, %v605_v28  ;;  %v629_v37 = vld [vmem:[%s941_s1 + $0x18] sm:$0xff]  ;;  %v634_v38 = vld [vmem:[%s941_s1 + $0x10] sm:$0xff] }
   0xa   :  { %v76_v24 = vsel %vm48_vm0, %v41_v21, 0.0  ;;  %v73_v25 = vsel %vm48_vm0, %v40_v22, 0.0  ;;  %v36_v32 = vmul.f32 %v610_v29, %v610_v29  ;;  %v623_v35 = vld [vmem:[%s940_s0] sm:$0xff]  ;;  %v35_v40 = vmul.f32 %v629_v37, %v629_v37  ;;  %v648_v45 = vld [vmem:[%s941_s1 + $0x8] sm:$0xff] }
   0xb   :  { %v70_v26 = vsel %vm48_vm0, %v39_v23, 0.0  ;;  %v64_v33 = vsel %vm48_vm0, %v37_v30, 0.0  ;;  %v67_v34 = vsel %vm48_vm0, %v38_v31, 0.0  ;;  %v290_v39 = vmul.f32 %v623_v35, %v623_v35  ;;  %v653_v46 = vld [vmem:[%s941_s1] sm:$0xff]  ;;  %s509_s1 = smov [#allocation3]  }
   0xc   :  { %v61_v36 = vsel %vm48_vm0, %v36_v32, 0.0  ;;  %v34_v41 = vmul.f32 %v634_v38, %v634_v38  ;;  %v58_v43 = vsel %vm48_vm0, %v35_v40, 0.0  ;;  %v33_v47 = vmul.f32 %v648_v45, %v648_v45  ;;  %s418_s14 = sshll.u32 %s509_s1, 4  ;;  %s419_s14 = int_to_ptr.vmem [resolvable:$true] %s418_s14 }
   0xd   :  { %92 = vadd.xlane.f32.xlu0 %v91_v15  ;;  %86 = vadd.xlane.f32.xlu1 %v85_v16  ;;  %v292_v42 = vsel %vm48_vm0, %v290_v39, 0.0  ;;  %v32_v48 = vmul.f32 %v653_v46, %v653_v46 }
   0xe   :  { %80 = vadd.xlane.f32.xlu2 %v79_v17  ;;  %v55_v44 = vsel %vm48_vm0, %v34_v41, 0.0  ;;  %v52_v49 = vsel %vm48_vm0, %v33_v47, 0.0 }
   0xf   :  { %v49_v50 = vsel %vm48_vm0, %v32_v48, 0.0 }
  0x15   :  { %77 = vadd.xlane.f32.xlu0 %v76_v24  ;;  %74 = vadd.xlane.f32.xlu1 %v73_v25 }
  0x16   :  { %71 = vadd.xlane.f32.xlu2 %v70_v26 }
  0x1d   :  { %65 = vadd.xlane.f32.xlu1 %v64_v33  ;;  %68 = vadd.xlane.f32.xlu0 %v67_v34 }
  0x1e   :  { %62 = vadd.xlane.f32.xlu2 %v61_v36 }
  0x25   :  { %293 = vadd.xlane.f32.xlu1 %v292_v42  ;;  %59 = vadd.xlane.f32.xlu0 %v58_v43 }
  0x26   :  { %56 = vadd.xlane.f32.xlu2 %v55_v44 }
  0x2d   :  { %53 = vadd.xlane.f32.xlu0 %v52_v49  ;;  %50 = vadd.xlane.f32.xlu1 %v49_v50 }
  0x78   :  { %v96_v51 = vpop.xlane.xlu0 %95  ;;  %v90_v52 = vpop.xlane.xlu1 %89 }
  0x79   :  { %447 = vrsqrt.f32 %v96_v51  ;;  %v84_v53 = vpop.xlane.xlu2 %83  ;;  %vm253_vm4 = vweird.f32 %v96_v51  ;;  %vm233_vm5 = vweird.f32 %v90_v52 }
  0x7a   :  { %449 = vrsqrt.f32 %v90_v52  ;;  %vm213_vm2 = vweird.f32 %v84_v53 }
  0x7b   :  { %451 = vrsqrt.f32 %v84_v53 }
  0x7f   :  { %v448_v54 = vpop.eup %447 }
  0x80   :  { %v450_v55 = vpop.eup %449  ;;  %v248_v56 = vmul.f32 %v448_v54, %v96_v51  ;;  %v661_v57 = vpop.xlane.xlu0 %92  ;;  %vm254_vm1 = vweird.f32 %v448_v54 }
  0x81   :  { %v663_v58 = vpop.xlane.xlu1 %86  ;;  %v452_v59 = vpop.eup %451  ;;  %v228_v60 = vmul.f32 %v450_v55, %v90_v52  ;;  %453 = vrsqrt.f32 %v661_v57  ;;  %vm234_vm6 = vweird.f32 %v450_v55  ;;  %vm674_vm7 = vmor %vm253_vm4, %vm254_vm1  ;;  %vm243_vm13 = vweird.f32 %v661_v57 }
  0x82   :  { %v666_v61 = vpop.xlane.xlu2 %80  ;;  %v249_v62 = vmul.f32 %v448_v54, %v248_v56  ;;  %v208_v63 = vmul.f32 %v452_v59, %v84_v53  ;;  %455 = vrsqrt.f32 %v663_v58  ;;  %vm214_vm3 = vweird.f32 %v452_v59  ;;  %vm235_vm9 = vmor %vm233_vm5, %vm234_vm6 }
  0x83   :  { %v229_v3 = vmul.f32 %v450_v55, %v228_v60  ;;  %457 = vrsqrt.f32 %v666_v61  ;;  %vm686_vm8 = vmor %vm213_vm2, %vm214_vm3  ;;  %vm203_vm10 = vweird.f32 %v666_v61  ;;  %vm223_vm14 = vweird.f32 %v663_v58 }
  0x84   :  { %v250_v4 = vmul.f32 0.5, %v249_v62  ;;  %v209_v5 = vmul.f32 %v452_v59, %v208_v63 }
  0x85   :  { %v230_v8 = vmul.f32 0.5, %v229_v3 }
  0x86   :  { %v251_v9 = vsub.f32 1.5, %v250_v4  ;;  %v210_v10 = vmul.f32 0.5, %v209_v5 }
  0x87   :  { %v670_v12 = vpop.eup %453  ;;  %v231_v13 = vsub.f32 1.5, %v230_v8 }
  0x88   :  { %v672_v14 = vpop.eup %455  ;;  %v252_v15 = vmul.f32 %v448_v54, %v251_v9  ;;  %v211_v17 = vsub.f32 1.5, %v210_v10  ;;  %v238_v21 = vmul.f32 %v670_v12, %v661_v57  ;;  %v680_v22 = vpop.xlane.xlu0 %77  ;;  %vm244_vm11 = vweird.f32 %v670_v12 }
  0x89   :  { %v682_v23 = vpop.xlane.xlu1 %74  ;;  %v458_v24 = vpop.eup %457  ;;  %v232_v25 = vmul.f32 %v450_v55, %v231_v13  ;;  %v218_v30 = vmul.f32 %v672_v14, %v663_v58  ;;  %459 = vrsqrt.f32 %v680_v22  ;;  %vm224_vm15 = vweird.f32 %v672_v14  ;;  %vm245_vm1 = vmor %vm243_vm13, %vm244_vm11 }
  0x8a   :  { %v693_v31 = vpop.xlane.xlu2 %71  ;;  %v256_v32 = vsel %vm674_vm7, %v448_v54, %v252_v15  ;;  %v212_v33 = vmul.f32 %v452_v59, %v211_v17  ;;  %v239_v34 = vmul.f32 %v670_v12, %v238_v21  ;;  %v198_v36 = vmul.f32 %v458_v24, %v666_v61  ;;  %vm225_vm3 = vmor %vm223_vm14, %vm224_vm15 }
  0x8b   :  { %v272_v39 = vmul.f32 %v256_v32, %v528_v0  ;;  %v236_v40 = vsel %vm235_vm9, %v450_v55, %v232_v25  ;;  %v219_v41 = vmul.f32 %v672_v14, %v218_v30  ;;  %461 = vrsqrt.f32 %v682_v23 }
  0x8c   :  { %v270_v42 = vmul.f32 %v236_v40, %v533_v1  ;;  %v216_v43 = vsel %vm686_vm8, %v452_v59, %v212_v33  ;;  %v240_v44 = vmul.f32 0.5, %v239_v34  ;;  %v199_v47 = vmul.f32 %v458_v24, %v198_v36 }
  0x8d   :  { %288 = vst.msk [vmem:[#allocation2 + $0x78] sm:$0xff] %vm48_vm0, %v272_v39  ;;  %v268_v48 = vmul.f32 %v216_v43, %v538_v2  ;;  %v220_v49 = vmul.f32 0.5, %v219_v41  ;;  %vm204_vm12 = vweird.f32 %v458_v24  ;;  %463 = vrsqrt.f32 %v693_v31 }
  0x8e   :  { %286 = vst.msk [vmem:[#allocation2 + $0x68] sm:$0xff] %vm48_vm0, %v270_v42  ;;  %v241_v0 = vsub.f32 1.5, %v240_v44  ;;  %v200_v50 = vmul.f32 0.5, %v199_v47  ;;  %vm732_vm2 = vmor %vm203_vm10, %vm204_vm12  ;;  %vm193_vm4 = vweird.f32 %v680_v22  ;;  %vm183_vm6 = vweird.f32 %v682_v23 }
  0x8f   :  { %v713_v1 = vpop.eup %459  ;;  %284 = vst.msk [vmem:[#allocation2 + $0x58] sm:$0xff] %vm48_vm0, %v268_v48  ;;  %v221_v51 = vsub.f32 1.5, %v220_v49  ;;  %vm173_vm7 = vweird.f32 %v693_v31 }
  0x90   :  { %v242_v2 = vmul.f32 %v670_v12, %v241_v0  ;;  %v201_v52 = vsub.f32 1.5, %v200_v50  ;;  %v188_v53 = vmul.f32 %v713_v1, %v680_v22  ;;  %v726_v55 = vpop.xlane.xlu0 %68  ;;  %vm194_vm5 = vweird.f32 %v713_v1 }
  0x91   :  { %v724_v54 = vpop.xlane.xlu1 %65  ;;  %v222_v56 = vmul.f32 %v672_v14, %v221_v51  ;;  %v742_v63 = vpop.eup %461  ;;  %vm163_vm9 = vweird.f32 %v726_v55  ;;  %vm195_vm11 = vmor %vm193_vm4, %vm194_vm5 }
  0x92   :  { %465 = vrsqrt.f32 %v724_v54  ;;  %v737_v58 = vpop.xlane.xlu2 %62  ;;  %v246_v59 = vsel %vm245_vm1, %v670_v12, %v242_v2  ;;  %v202_v60 = vmul.f32 %v458_v24, %v201_v52  ;;  %v189_v62 = vmul.f32 %v713_v1, %v188_v53 }
  0x93   :  { %467 = vrsqrt.f32 %v726_v55  ;;  %v271_v61 = vmul.f32 %v246_v59, %v549_v6  ;;  %v226_v3 = vsel %vm225_vm3, %v672_v14, %v222_v56  ;;  %v747_v4 = vpop.eup %463  ;;  %v178_v10 = vmul.f32 %v742_v63, %v682_v23 }
  0x94   :  { %469 = vrsqrt.f32 %v737_v58  ;;  %v269_v5 = vmul.f32 %v226_v3, %v554_v7  ;;  %v206_v8 = vsel %vm732_vm2, %v458_v24, %v202_v60  ;;  %v190_v9 = vmul.f32 0.5, %v189_v62  ;;  %v340_v12 = vld [vmem:[#allocation2 + $0x78] sm:$0xff] }
  0x95   :  { %287 = vst.msk [vmem:[#allocation2 + $0x70] sm:$0xff] %vm48_vm0, %v271_v61  ;;  %v267_v6 = vmul.f32 %v206_v8, %v562_v11  ;;  %v168_v13 = vmul.f32 %v747_v4, %v693_v31  ;;  %429 = vmatpush.xpose.msk.msra.mxu0 %vm48_vm0, %v340_v12  ;;  %v179_v14 = vmul.f32 %v742_v63, %v178_v10  ;;  %vm153_vm8 = vweird.f32 %v724_v54  ;;  %v338_v62 = vld [vmem:[#allocation2 + $0x68] sm:$0xff] }
  0x96   :  { %285 = vst.msk [vmem:[#allocation2 + $0x60] sm:$0xff] %vm48_vm0, %v269_v5  ;;  %v191_v7 = vsub.f32 1.5, %v190_v9  ;;  %vm184_vm10 = vweird.f32 %v742_v63  ;;  %vm174_vm12 = vweird.f32 %v747_v4  ;;  %vm143_vm13 = vweird.f32 %v737_v58 }
  0x97   :  { %283 = vst.msk [vmem:[#allocation2 + $0x50] sm:$0xff] %vm48_vm0, %v267_v6  ;;  %v169_v11 = vmul.f32 %v747_v4, %v168_v13  ;;  %v180_v21 = vmul.f32 0.5, %v179_v14  ;;  %vm799_vm14 = vmor %vm183_vm6, %vm184_vm10 }
  0x98   :  { %v764_v15 = vpop.eup %465  ;;  %v192_v17 = vmul.f32 %v713_v1, %v191_v7  ;;  %v779_v26 = vpop.xlane.xlu0 %59  ;;  %vm811_vm15 = vmor %vm173_vm7, %vm174_vm12 }
  0x99   :  { %v771_v16 = vpop.eup %467  ;;  %v148_v24 = vmul.f32 %v764_v15, %v724_v54  ;;  %v777_v25 = vpop.xlane.xlu1 %293  ;;  %v170_v32 = vmul.f32 0.5, %v169_v11  ;;  %v181_v36 = vsub.f32 1.5, %v180_v21  ;;  %vm154_vm1 = vweird.f32 %v764_v15 }
  0x9a   :  { %v781_v30 = vpop.eup %469  ;;  %v158_v33 = vmul.f32 %v771_v16, %v726_v55  ;;  %471 = vrsqrt.f32 %v777_v25  ;;  %v196_v34 = vsel %vm195_vm11, %v713_v1, %v192_v17  ;;  %v806_v44 = vpop.xlane.xlu2 %56  ;;  %vm164_vm2 = vweird.f32 %v771_v16  ;;  %vm835_vm4 = vmor %vm153_vm8, %vm154_vm1 }
  0x9b   :  { %v149_v39 = vmul.f32 %v764_v15, %v148_v24  ;;  %v266_v40 = vmul.f32 %v196_v34, %v576_v18  ;;  %v171_v41 = vsub.f32 1.5, %v170_v32  ;;  %v138_v43 = vmul.f32 %v781_v30, %v737_v58  ;;  %vm845_vm5 = vmor %vm163_vm9, %vm164_vm2 }
  0x9c   :  { %v159_v42 = vmul.f32 %v771_v16, %v158_v33  ;;  %v182_v47 = vmul.f32 %v742_v63, %v181_v36  ;;  %v339_v48 = vld [vmem:[#allocation2 + $0x70] sm:$0xff]  ;;  %473 = vrsqrt.f32 %v779_v26  ;;  %vm144_vm3 = vweird.f32 %v781_v30  ;;  %v336_v36 = vld [vmem:[#allocation2 + $0x58] sm:$0xff] }
  0x9d   :  { %v150_v23 = vmul.f32 0.5, %v149_v39  ;;  %282 = vst.msk [vmem:[#allocation2 + $0x48] sm:$0xff] %vm48_vm0, %v266_v40  ;;  %v172_v49 = vmul.f32 %v747_v4, %v171_v41  ;;  %v139_v50 = vmul.f32 %v781_v30, %v138_v43  ;;  %430 = vmatpush.xpose.msk.msra.mxu0 %vm48_vm0, %v339_v48  ;;  %475 = vrsqrt.f32 %v806_v44  ;;  %vm866_vm6 = vmor %vm143_vm13, %vm144_vm3  ;;  %v337_v14 = vld [vmem:[#allocation2 + $0x60] sm:$0xff] }
  0x9e   :  { %v160_v0 = vmul.f32 0.5, %v159_v42  ;;  %v186_v31 = vsel %vm799_vm14, %v742_v63, %v182_v47  ;;  %vm301_vm7 = vweird.f32 %v777_v25  ;;  %vm133_vm10 = vweird.f32 %v779_v26 }
  0x9f   :  { %v151_v1 = vsub.f32 1.5, %v150_v23  ;;  %v265_v2 = vmul.f32 %v186_v31, %v581_v19  ;;  %v176_v52 = vsel %vm811_vm15, %v747_v4, %v172_v49  ;;  %v140_v57 = vmul.f32 0.5, %v139_v50  ;;  %v335_v49 = vld [vmem:[#allocation2 + $0x50] sm:$0xff] }
  0xa0   :  { %v472_v51 = vpop.eup %471  ;;  %v161_v56 = vsub.f32 1.5, %v160_v0  ;;  %v264_v59 = vmul.f32 %v176_v52, %v586_v20  ;;  %v850_v63 = vpop.xlane.xlu0 %53  ;;  %vm123_vm12 = vweird.f32 %v806_v44 }
  0xa1   :  { %v152_v60 = vmul.f32 %v764_v15, %v151_v1  ;;  %v296_v54 = vmul.f32 %v472_v51, %v777_v25  ;;  %v852_v61 = vpop.xlane.xlu1 %50  ;;  %281 = vst.msk [vmem:[#allocation2 + $0x40] sm:$0xff] %vm48_vm0, %v265_v2  ;;  %v141_v3 = vsub.f32 1.5, %v140_v57  ;;  %431 = vmatpush.xpose.msk.msra.mxu0 %vm48_vm0, %v338_v62  ;;  %477 = vrsqrt.f32 %v850_v63 }
  0xa2   :  { %v162_v20 = vmul.f32 %v771_v16, %v161_v56  ;;  %v474_v55 = vpop.eup %473  ;;  %280 = vst.msk [vmem:[#allocation2 + $0x38] sm:$0xff] %vm48_vm0, %v264_v59  ;;  %479 = vrsqrt.f32 %v852_v61  ;;  %vm302_vm8 = vweird.f32 %v472_v51  ;;  %vm113_vm1 = vweird.f32 %v850_v63 }
  0xa3   :  { %v156_v4 = vsel %vm835_vm4, %v764_v15, %v152_v60  ;;  %v297_v5 = vmul.f32 %v472_v51, %v296_v54  ;;  %v142_v12 = vmul.f32 %v781_v30, %v141_v3  ;;  %v128_v6 = vmul.f32 %v474_v55, %v779_v26  ;;  %v476_v13 = vpop.eup %475  ;;  %vm887_vm9 = vmor %vm301_vm7, %vm302_vm8 }
  0xa4   :  { %v262_v9 = vmul.f32 %v156_v4, %v600_v27  ;;  %v166_v10 = vsel %vm845_vm5, %v771_v16, %v162_v20  ;;  %v118_v11 = vmul.f32 %v476_v13, %v806_v44  ;;  %vm134_vm11 = vweird.f32 %v474_v55  ;;  %v334_v53 = vld [vmem:[#allocation2 + $0x48] sm:$0xff] }
  0xa5   :  { %v263_v7 = vmul.f32 %v166_v10, %v605_v28  ;;  %v298_v58 = vmul.f32 0.5, %v297_v5  ;;  %v146_v27 = vsel %vm866_vm6, %v781_v30, %v142_v12  ;;  %v129_v15 = vmul.f32 %v474_v55, %v128_v6  ;;  %432 = vmatpush.xpose.msk.msra.mxu0 %vm48_vm0, %v337_v14  ;;  %vm135_vm14 = vmor %vm133_vm10, %vm134_vm11 }
  0xa6   :  { %278 = vst.msk [vmem:[#allocation2 + $0x28] sm:$0xff] %vm48_vm0, %v262_v9  ;;  %v261_v28 = vmul.f32 %v146_v27, %v610_v29  ;;  %v119_v30 = vmul.f32 %v476_v13, %v118_v11  ;;  %vm124_vm13 = vweird.f32 %v476_v13  ;;  %vm103_vm3 = vweird.f32 %v852_v61 }
  0xa7   :  { %279 = vst.msk [vmem:[#allocation2 + $0x30] sm:$0xff] %vm48_vm0, %v263_v7  ;;  %v299_v16 = vsub.f32 1.5, %v298_v58  ;;  %v478_v17 = vpop.eup %477  ;;  %v130_v24 = vmul.f32 0.5, %v129_v15  ;;  %vm907_vm15 = vmor %vm123_vm12, %vm124_vm13 }
  0xa8   :  { %v480_v32 = vpop.eup %479  ;;  %277 = vst.msk [vmem:[#allocation2 + $0x20] sm:$0xff] %vm48_vm0, %v261_v28  ;;  %v108_v34 = vmul.f32 %v478_v17, %v850_v63  ;;  %v120_v39 = vmul.f32 0.5, %v119_v30  ;;  %vm114_vm2 = vweird.f32 %v478_v17  ;;  %v333_v60 = vld [vmem:[#allocation2 + $0x40] sm:$0xff] }
  0xa9   :  { %v300_v33 = vmul.f32 %v472_v51, %v299_v16  ;;  %v131_v29 = vsub.f32 1.5, %v130_v24  ;;  %433 = vmatpush.xpose.msk.msra.mxu0 %vm48_vm0, %v336_v36  ;;  %v98_v40 = vmul.f32 %v480_v32, %v852_v61  ;;  %vm104_vm4 = vweird.f32 %v480_v32  ;;  %vm115_vm5 = vmor %vm113_vm1, %vm114_vm2 }
  0xaa   :  { %v109_v41 = vmul.f32 %v478_v17, %v108_v34  ;;  %v121_v47 = vsub.f32 1.5, %v120_v39  ;;  %vm105_vm6 = vmor %vm103_vm3, %vm104_vm4 }
  0xab   :  { %v899_v22 = vsel %vm887_vm9, %v472_v51, %v300_v33  ;;  %v132_v43 = vmul.f32 %v474_v55, %v131_v29  ;;  %v99_v18 = vmul.f32 %v480_v32, %v98_v40 }
  0xac   :  { %v305_v42 = vmul.f32 %v899_v22, %v777_v25  ;;  %v110_v48 = vmul.f32 0.5, %v109_v41  ;;  %v122_v0 = vmul.f32 %v476_v13, %v121_v47 }
  0xad   :  { %v136_v26 = vsel %vm135_vm14, %v474_v55, %v132_v43  ;;  %434 = vmatpush.xpose.msk.msra.mxu0 %vm48_vm0, %v335_v49  ;;  %v100_v31 = vmul.f32 0.5, %v99_v18  ;;  %v330_v61 = vld [vmem:[#allocation2 + $0x28] sm:$0xff] }
  0xae   :  { %v260_v25 = vmul.f32 %v136_v26, %v629_v37  ;;  %v111_v50 = vsub.f32 1.5, %v110_v48  ;;  %v308_v44 = vadd.f32 1.0, %v305_v42  ;;  %v126_v1 = vsel %vm907_vm15, %v476_v13, %v122_v0  ;;  %v331_v62 = vld [vmem:[#allocation2 + $0x30] sm:$0xff] }
  0xaf   :  { %v259_v51 = vmul.f32 %v126_v1, %v634_v38  ;;  %v101_v52 = vsub.f32 1.5, %v100_v31  ;;  %v332_v38 = vld [vmem:[#allocation2 + $0x38] sm:$0xff]  ;;  %v329_v20 = vld [vmem:[#allocation2 + $0x20] sm:$0xff]  ;;  %v306_v8 = vmul.f32 16.0, %v305_v42 }
  0xb0   :  { %276 = vst.msk [vmem:[#allocation2 + $0x18] sm:$0xff] %vm48_vm0, %v260_v25  ;;  %v112_v2 = vmul.f32 %v478_v17, %v111_v50  ;;  %481 = vrcp.f32 %v308_v44  ;;  %v320_v4 = vand.u32 2147483648, %v308_v44  ;;  %vm314_vm8 = vweird.f32 %v308_v44 }
  0xb1   :  { %435 = vmatpush.xpose.msk.msra.mxu0 %vm48_vm0, %v334_v53  ;;  %275 = vst.msk [vmem:[#allocation2 + $0x10] sm:$0xff] %vm48_vm0, %v259_v51  ;;  %v102_v56 = vmul.f32 %v480_v32, %v101_v52  ;;  %v318_v5 = vand.u32 2147483647, %v308_v44  ;;  %v307_v13 = vmul.f32 %v306_v8, %v899_v22 }
  0xb2   :  { %v116_v37 = vsel %vm115_vm5, %v478_v17, %v112_v2  ;;  %v321_v12 = vor.u32 1.1754944e-38, %v320_v4 }
  0xb3   :  { %v258_v57 = vmul.f32 %v116_v37, %v648_v45  ;;  %v106_v59 = vsel %vm105_vm6, %v480_v32, %v102_v56  ;;  %vm319_vm10 = vcmp.eq.f32.partialorder %v318_v5, 8.507059e+37 }
  0xb4   :  { %v257_v19 = vmul.f32 %v106_v59, %v653_v46 }
  0xb5   :  { %274 = vst.msk [vmem:[#allocation2 + $0x8] sm:$0xff] %vm48_vm0, %v258_v57  ;;  %436 = vmatpush.xpose.msk.msra.mxu0 %vm48_vm0, %v333_v60 }
  0xb6   :  { %273 = vst.msk [vmem:[#allocation2] sm:$0xff] %vm48_vm0, %v257_v19  ;;  %v482_v54 = vpop.eup %481 }
  0xb7   :  { %v310_v63 = vmul.f32 %v482_v54, %v308_v44  ;;  %v328_v46 = vld [vmem:[#allocation2 + $0x18] sm:$0xff]  ;;  %vm315_vm7 = vweird.f32 %v482_v54 }
  0xb8   :  { %vm316_vm9 = vmor %vm314_vm8, %vm315_vm7  ;;  %v327_v9 = vld [vmem:[#allocation2 + $0x10] sm:$0xff] }
  0xb9   :  { %437 = vmatpush.xpose.msk.msra.mxu0 %vm48_vm0, %v332_v38  ;;  %v311_v45 = vsub.f32 1.0, %v310_v63 }
  0xbb   :  { %v312_v3 = vmul.f32 %v482_v54, %v311_v45 }
  0xbc   :  { %v326_v7 = vld [vmem:[#allocation2 + $0x8] sm:$0xff] }
  0xbd   :  { %438 = vmatpush.xpose.msk.msra.mxu0 %vm48_vm0, %v331_v62  ;;  %v313_v55 = vadd.f32 %v482_v54, %v312_v3  ;;  %v325_v14 = vld [vmem:[#allocation2] sm:$0xff] }
  0xbf   :  { %v317_v10 = vsel %vm316_vm9, %v482_v54, %v313_v55 }
  0xc0   :  { %v322_v6 = vsel %vm319_vm10, %v321_v12, %v317_v10 }
  0xc1   :  { %439 = vmatpush.xpose.msk.msra.mxu0 %vm48_vm0, %v330_v61  ;;  %v323_v58 = vmul.f32 %v322_v6, %v307_v13 }
  0xc3   :  { %v324_v27 = vmul.f32 %v323_v58, %v623_v35 }
  0xc5   :  { %440 = vmatpush.xpose.msk.msra.mxu0 %vm48_vm0, %v329_v20 }
  0xc9   :  { %441 = vmatpush.xpose.msk.msra.mxu0 %vm48_vm0, %v328_v46 }
  0xcd   :  { %442 = vmatpush.xpose.msk.msra.mxu0 %vm48_vm0, %v327_v9 }
  0xd1   :  { %443 = vmatpush.xpose.msk.msra.mxu0 %vm48_vm0, %v326_v7 }
  0xd5   :  { %444 = vmatpush.xpose.msk.msra.mxu0 %vm48_vm0, %v325_v14 }
  0xd8   :  { %445 = vmatmul.msk.f32.vlgmr.msra.gmra.mxu0 %vm48_vm0, %v324_v27 }
 0x155   :  { %v409_v15 = vpop.f32.mrf.mxu0 }
 0x156   :  { %412 = vst [vmem:[#allocation3] sm:$0xff] %v409_v15 }
 0x157   :  { %423 = dma.vmem_to_hbm [thread:$0]  %s419_s14, 128, %s421_s17, [#allocation4]  }
 0x158   :  { %507 = dma.done.wait [#allocation4], 128  }
 0x159   :  { %508 = vsyncadd [#allocation4], 4294967168 }
 0x15a   :  { %428 = vsyncpa [#allocation4], 1 }

</bundles_post_ra>
